<compile_context>
chip_gen: v7x
topology: tpu7x:2x2x1
jax: 0.10.0
libtpu: 0.0.40
codegen_flags: <defaults>
</compile_context>

<pallas_src>
import functools

import jax
import jax.numpy as jnp
import numpy as np
from jax.experimental import pallas as pl
from jax.experimental.pallas import tpu as pltpu

_NEG_BIG = -1e30  # finite "-inf": row 0 is always valid so max_t >= 0 and
                  # exp(_NEG_BIG - max_t) underflows to exactly 0.


def _round_up(x, m):
    return (x + m - 1) // m * m


def _mfrm_kernel(w_pt_ref, w_s_ref, idx_ref, out_ref, *,
                 N_trait, N_strat, N_rst, K_max,
                 threshold_scale, batch, tile_b):
    f32 = jnp.float32
    TB = tile_b
    n_pt_pad = w_pt_ref.shape[1]
    n_s_pad = w_s_ref.shape[1]

    idx = idx_ref[...]                      # (6, TB) int32: p, r, st, k, m, t
    p = idx[0:1, :]
    r = idx[1:2, :]
    st = idx[2:3, :]
    k = idx[3:4, :]
    m = idx[4:5, :]
    t = idx[5:6, :]

    # ---- person_trait lookup: one-hot over its own padded width only --------
    col_pt = p * N_trait + t                                     # (1, TB)
    iota_pt = jax.lax.broadcasted_iota(jnp.int32, (n_pt_pad, TB), 0)
    hot_pt = (iota_pt == col_pt).astype(f32)                     # 1 cmp + cast
    emb_pt = jnp.dot(w_pt_ref[...], hot_pt, preferred_element_type=f32)  # (8, TB)
    Bv = emb_pt[0:1, :]

    # ---- rater_set_trait + thresholds: 2-hot over the small fused table -----
    # cols [0, N_rst)              -> rater_set_trait         -> row 0
    # row 1 of the table is all-zero (becomes T_all's leading zero category)
    # cols [N_rst, N_rst+N_strat)  -> threshold_raw (K_max)   -> rows 2..
    col_rst = r * N_strat + st
    col_st = N_rst + st
    iota_s = jax.lax.broadcasted_iota(jnp.int32, (n_s_pad, TB), 0)
    hot_s = ((iota_s == col_rst) | (iota_s == col_st)).astype(f32)
    emb_s = jnp.dot(w_s_ref[...], hot_s, preferred_element_type=f32)  # (ROWS_S, TB)
    Rv = emb_s[0:1, :]
    thr = emb_s[1:2 + K_max, :]      # (K_max+1, TB); row 0 == 0 (zero weight row)

    # ---- thresholds: softplus + log-depth prefix sum over sublanes ----------
    x = thr * threshold_scale
    sp = jnp.maximum(x, 0.0) + jnp.log(1.0 + jnp.exp(-jnp.abs(x)))    # softplus
    j_iota = jax.lax.broadcasted_iota(jnp.int32, (K_max + 1, TB), 0)
    sp = jnp.where(j_iota >= 2, sp, 0.0)     # rows 0,1 contribute 0 (sp[0] cancels)
    T_all = sp
    shift = 1
    while shift <= K_max:                    # ceil(log2(K_max+1)) steps, no concat chain
        shifted = jnp.concatenate(
            [jnp.zeros((shift, TB), f32), T_all[:K_max + 1 - shift, :]], axis=0)
        T_all = T_all + shifted
        shift *= 2
    # T_all[j] = sum_{i=1..j-1} softplus(thr_raw[i]*scale); T_all[0]=T_all[1]=0

    logits = Bv - Rv                                             # (1, TB)

    # ---- numerator: T_all at category k (sublane select + reduce) -----------
    sel_k = (j_iota == k).astype(f32)
    step_k = jnp.sum(T_all * sel_k, axis=0, keepdims=True)       # (1, TB)
    log_numer = k.astype(f32) * logits - step_k

    # ---- denominator: masked logsumexp over categories 0..m-1 ---------------
    G = j_iota.astype(f32)
    log_terms = G * logits - T_all                               # (K_max+1, TB)
    log_terms = jnp.where(j_iota < m, log_terms, _NEG_BIG)
    max_t = jnp.max(log_terms, axis=0, keepdims=True)            # row 0 valid -> >= 0
    log_denom = max_t + jnp.log(
        jnp.sum(jnp.exp(log_terms - max_t), axis=0, keepdims=True))

    # ---- per-example loss, masked, lane-folded to a (1, 128) partial sum ----
    nll = log_denom - log_numer                                  # (1, TB)
    lane = jax.lax.broadcasted_iota(jnp.int32, (1, TB), 1)
    valid = (pl.program_id(0) * TB + lane) < batch
    nll = jnp.where(valid, nll, 0.0)

    acc = nll[:, 0:128]
    for c in range(1, TB // 128):            # 1-vreg adds; trivial
        acc = acc + nll[:, c * 128:(c + 1) * 128]
    out_ref[...] = acc


def mfrm_loss(params, p, r, st, k, m, t, *, N_trait, N_strat, K_max,
              threshold_scale=0.2, tile_b=4096):
    B = int(p.shape[0])
    N_pt = params["pt_w"].shape[0]
    N_rst = params["rst_w"].shape[0]
    n_pt_pad = _round_up(N_pt, 128)
    n_s_pad = _round_up(N_rst + N_strat, 128)
    rows_s = _round_up(2 + K_max, 8)

    # ---- tile selection: amortize grid-step overhead, stay in a v7x-safe ----
    # ---- VMEM budget, and keep >= 2 tiles when B allows (megacore / 2 TCs) --
    per_lane_bytes = (8 * (n_pt_pad + n_s_pad)   # hot(f32)+iota(i32) per table
                      + 2 * 6 * 4                # double-buffered packed idx
                      + 8 * (K_max + 10))        # emb / T_all / log_terms rows
    budget = 12 << 20                            # intermediate budget (<< 64 MiB v7x)
    tile_cap = max(128, (budget // per_lane_bytes) // 128 * 128)
    b_ceil = _round_up(B, 128)
    TILE_B = min(_round_up(tile_b, 128), tile_cap, 8192)
    if TILE_B >= b_ceil and b_ceil >= 256:
        TILE_B = _round_up(b_ceil // 2, 128)     # keep both TensorCores busy
    TILE_B = max(128, min(TILE_B, b_ceil))
    B_pad = _round_up(B, TILE_B)
    num_tiles = B_pad // TILE_B

    # ---- pack the six index vectors into one (6, B_pad) int32 array ---------
    def pad_idx(a, fill=0):
        a = jnp.asarray(a, jnp.int32)
        return jnp.pad(a, (0, B_pad - B), constant_values=fill)

    packed = jnp.stack([pad_idx(p), pad_idx(r), pad_idx(st), pad_idx(k),
                        pad_idx(m, fill=1),      # keep padded lanes finite
                        pad_idx(t)], axis=0)

    # ---- per-table fused weights (built once, resident in VMEM) -------------
    w_pt = jnp.zeros((8, n_pt_pad), jnp.float32)
    w_pt = w_pt.at[0, :N_pt].set(params["pt_w"][:, 0].astype(jnp.float32))

    w_s = jnp.zeros((rows_s, n_s_pad), jnp.float32)
    w_s = w_s.at[0, :N_rst].set(params["rst_w"][:, 0].astype(jnp.float32))
    # row 1 stays all-zero -> leading zero category of T_all
    w_s = w_s.at[2:2 + K_max, N_rst:N_rst + N_strat].set(
        params["thr_w"].T.astype(jnp.float32))

    # ---- VMEM limit computed from actual sizes (not hard-coded) -------------
    resident_bytes = 4 * (8 * n_pt_pad + rows_s * n_s_pad)
    step_bytes = per_lane_bytes * TILE_B + 2 * 4 * 128
    vmem_limit = int(min(max(2 * resident_bytes + step_bytes + (2 << 20), 16 << 20),
                         64 << 20))

    kernel = functools.partial(
        _mfrm_kernel,
        N_trait=N_trait, N_strat=N_strat, N_rst=N_rst, K_max=K_max,
        threshold_scale=threshold_scale, batch=B, tile_b=TILE_B)

    partial_sums = pl.pallas_call(
        kernel,
        out_shape=jax.ShapeDtypeStruct((1, num_tiles * 128), jnp.float32),
        grid_spec=pltpu.PrefetchScalarGridSpec(
            num_scalar_prefetch=0,
            grid=(num_tiles,),
            in_specs=[
                # resident fused tables, single-buffered
                pl.BlockSpec((8, n_pt_pad), lambda i: (0, 0),
                             pipeline_mode=pl.Buffered(1)),
                pl.BlockSpec((rows_s, n_s_pad), lambda i: (0, 0),
                             pipeline_mode=pl.Buffered(1)),
                # packed indices, one lane-dense tile per grid step
                pl.BlockSpec((6, TILE_B), lambda i: (0, i)),
            ],
            out_specs=pl.BlockSpec((1, 128), lambda i: (0, i)),
        ),
        compiler_params=pltpu.CompilerParams(
            dimension_semantics=("parallel",),
            vmem_limit_bytes=vmem_limit),
    )(w_pt, w_s, packed)

    # Padded lanes contributed exactly 0 to every partial sum.
    return jnp.sum(partial_sums) / B


def mfrm_loss_ref(params, p, r, st, k, m, t, *, N_trait, N_strat, K_max,
                  threshold_scale=0.2):
    """Pure-JAX reference mirroring the PyTorch forward."""
    Bv = params["pt_w"][p * N_trait + t, 0]
    Rv = params["rst_w"][r * N_strat + st, 0]
    T_raw = params["thr_w"][st]
    sp = jax.nn.softplus(T_raw * threshold_scale)
    T_cum = jnp.cumsum(sp, axis=1)
    T_cum = T_cum - T_cum[:, :1]
    logits = Bv - Rv
    T_all = jnp.concatenate(
        [jnp.zeros((p.shape[0], 1), jnp.float32), T_cum], axis=1)
    step_k = jnp.take_along_axis(T_all, k[:, None], axis=1)[:, 0]
    log_numer = k.astype(jnp.float32) * logits - step_k
    G = jnp.arange(K_max + 1, dtype=jnp.float32)[None, :]
    log_terms = G * logits[:, None] - T_all
    log_terms = jnp.where(G < m[:, None], log_terms, -jnp.inf)
    log_denom = jax.scipy.special.logsumexp(log_terms, axis=1)
    return jnp.mean(-(log_numer - log_denom))


if __name__ == "__main__":
    # Small, MFRM-consistent shapes.
    N_person, N_trait, N_rater, N_strat, K_max = 6, 3, 4, 2, 4

    key = jax.random.PRNGKey(0)
    k1, k2, k3, k4 = jax.random.split(key, 4)

    params = {
        "pt_w": jax.random.normal(k1, (N_person * N_trait, 1), jnp.float32),
        "rst_w": jax.random.normal(k2, (N_rater * N_strat, 1), jnp.float32),
        "thr_w": 0.01 * jax.random.normal(k3, (N_strat, K_max), jnp.float32),
    }

    # batch=8 exercises the single-tile path; batch=300 exercises multi-tile
    # (2 tiles) with lane masking on the last tile.
    for batch in (8, 300):
        kp, kr, kst, kt, km, kk = jax.random.split(jax.random.fold_in(k4, batch), 6)
        p = jax.random.randint(kp, (batch,), 0, N_person)
        r = jax.random.randint(kr, (batch,), 0, N_rater)
        st = jax.random.randint(kst, (batch,), 0, N_strat)
        t = jax.random.randint(kt, (batch,), 0, N_trait)
        m = jax.random.randint(km, (batch,), 1, K_max + 2)   # valid cats, m >= 1
        k_cat = jnp.minimum(jax.random.randint(kk, (batch,), 0, K_max + 1), m - 1)

        loss = mfrm_loss(params, p, r, st, k_cat, m, t,
                         N_trait=N_trait, N_strat=N_strat, K_max=K_max)
        jax.block_until_ready(loss)

        loss_ref = mfrm_loss_ref(params, p, r, st, k_cat, m, t,
                                 N_trait=N_trait, N_strat=N_strat, K_max=K_max)
        np.testing.assert_allclose(np.asarray(loss), np.asarray(loss_ref),
                                   rtol=1e-5, atol=1e-5)

    print("KERNEL_OK")
</pallas_src>

<mosaic_0001>
module attributes {stable_mosaic.version = 11 : i64} {
  func.func @_mfrm_kernel(%arg0: i32, %arg1: memref<8x128xf32, #tpu.memory_space<vmem>>, %arg2: memref<8x128xf32, #tpu.memory_space<vmem>>, %arg3: memref<6x128xi32, #tpu.memory_space<vmem>>, %arg4: memref<1x128xf32, #tpu.memory_space<vmem>>) attributes {dimension_semantics = [#tpu.dimension_semantics<parallel>], iteration_bounds = array<i64: 1>, scalar_prefetch = 0 : i64, scratch_operands = 0 : i64, tpu.core_type = #tpu.core_type<tc>, window_params = [{pipeline_mode = #tpu.pipeline_mode<synchronous>, transform_indices = @transform_0, window_bounds = array<i64: 8, 128>}, {pipeline_mode = #tpu.pipeline_mode<synchronous>, transform_indices = @transform_1, window_bounds = array<i64: 8, 128>}, {transform_indices = @transform_2, window_bounds = array<i64: 6, 128>}, {transform_indices = @transform_3, window_bounds = array<i64: 1, 128>}]} {
    %c0 = arith.constant 0 : index
    %c0_0 = arith.constant 0 : index
    %0 = vector.load %arg3[%c0, %c0_0] : memref<6x128xi32, #tpu.memory_space<vmem>>, vector<6x128xi32>
    %1 = vector.extract_strided_slice %0 {offsets = [0, 0], sizes = [1, 128], strides = [1, 1]} : vector<6x128xi32> to vector<1x128xi32>
    %2 = vector.extract_strided_slice %0 {offsets = [1, 0], sizes = [1, 128], strides = [1, 1]} : vector<6x128xi32> to vector<1x128xi32>
    %3 = vector.extract_strided_slice %0 {offsets = [2, 0], sizes = [1, 128], strides = [1, 1]} : vector<6x128xi32> to vector<1x128xi32>
    %4 = vector.extract_strided_slice %0 {offsets = [3, 0], sizes = [1, 128], strides = [1, 1]} : vector<6x128xi32> to vector<1x128xi32>
    %5 = vector.extract_strided_slice %0 {offsets = [4, 0], sizes = [1, 128], strides = [1, 1]} : vector<6x128xi32> to vector<1x128xi32>
    %6 = vector.extract_strided_slice %0 {offsets = [5, 0], sizes = [1, 128], strides = [1, 1]} : vector<6x128xi32> to vector<1x128xi32>
    %c3_i32 = arith.constant 3 : i32
    %7 = vector.broadcast %c3_i32 : i32 to vector<1x128xi32>
    %8 = arith.muli %1, %7 : vector<1x128xi32>
    %9 = arith.addi %8, %6 : vector<1x128xi32>
    %10 = tpu.iota {dimensions = array<i32: 0>} : vector<128x128xi32>
    %11 = vector.broadcast %9 : vector<1x128xi32> to vector<128x128xi32>
    %12 = arith.cmpi eq, %10, %11 : vector<128x128xi32>
    %13 = arith.extui %12 : vector<128x128xi1> to vector<128x128xi32>
    %14 = arith.sitofp %13 : vector<128x128xi32> to vector<128x128xf32>
    %c0_1 = arith.constant 0 : index
    %c0_2 = arith.constant 0 : index
    %15 = vector.load %arg1[%c0_1, %c0_2] : memref<8x128xf32, #tpu.memory_space<vmem>>, vector<8x128xf32>
    %cst = arith.constant dense<0.000000e+00> : vector<8x128xf32>
    %16 = tpu.matmul %15, %14, %cst {dimension_numbers = #tpu.dot_dimension_numbers<[1], [0], [0], [1], [0, 0, 1, 1], [], []>} : vector<8x128xf32>, vector<128x128xf32>, vector<8x128xf32> -> vector<8x128xf32>
    %17 = vector.extract_strided_slice %16 {offsets = [0, 0], sizes = [1, 128], strides = [1, 1]} : vector<8x128xf32> to vector<1x128xf32>
    %c2_i32 = arith.constant 2 : i32
    %18 = vector.broadcast %c2_i32 : i32 to vector<1x128xi32>
    %19 = arith.muli %2, %18 : vector<1x128xi32>
    %20 = arith.addi %19, %3 : vector<1x128xi32>
    %c8_i32 = arith.constant 8 : i32
    %21 = vector.broadcast %c8_i32 : i32 to vector<1x128xi32>
    %22 = arith.addi %21, %3 : vector<1x128xi32>
    %23 = tpu.iota {dimensions = array<i32: 0>} : vector<128x128xi32>
    %24 = vector.broadcast %20 : vector<1x128xi32> to vector<128x128xi32>
    %25 = arith.cmpi eq, %23, %24 : vector<128x128xi32>
    %26 = vector.broadcast %22 : vector<1x128xi32> to vector<128x128xi32>
    %27 = arith.cmpi eq, %23, %26 : vector<128x128xi32>
    %28 = arith.ori %25, %27 : vector<128x128xi1>
    %29 = arith.extui %28 : vector<128x128xi1> to vector<128x128xi32>
    %30 = arith.sitofp %29 : vector<128x128xi32> to vector<128x128xf32>
    %c0_3 = arith.constant 0 : index
    %c0_4 = arith.constant 0 : index
    %31 = vector.load %arg2[%c0_3, %c0_4] : memref<8x128xf32, #tpu.memory_space<vmem>>, vector<8x128xf32>
    %cst_5 = arith.constant dense<0.000000e+00> : vector<8x128xf32>
    %32 = tpu.matmul %31, %30, %cst_5 {dimension_numbers = #tpu.dot_dimension_numbers<[1], [0], [0], [1], [0, 0, 1, 1], [], []>} : vector<8x128xf32>, vector<128x128xf32>, vector<8x128xf32> -> vector<8x128xf32>
    %33 = vector.extract_strided_slice %32 {offsets = [0, 0], sizes = [1, 128], strides = [1, 1]} : vector<8x128xf32> to vector<1x128xf32>
    %34 = vector.extract_strided_slice %32 {offsets = [1, 0], sizes = [5, 128], strides = [1, 1]} : vector<8x128xf32> to vector<5x128xf32>
    %cst_6 = arith.constant 2.000000e-01 : f32
    %35 = vector.broadcast %cst_6 : f32 to vector<5x128xf32>
    %36 = arith.mulf %34, %35 : vector<5x128xf32>
    %cst_7 = arith.constant 0.000000e+00 : f32
    %37 = vector.broadcast %cst_7 : f32 to vector<5x128xf32>
    %38 = arith.maximumf %36, %37 : vector<5x128xf32>
    %39 = math.absf %36 : vector<5x128xf32>
    %cst_8 = arith.constant 0.000000e+00 : f32
    %40 = vector.broadcast %cst_8 : f32 to vector<5x128xf32>
    %41 = arith.subf %40, %39 : vector<5x128xf32>
    %42 = math.exp %41 : vector<5x128xf32>
    %cst_9 = arith.constant 1.000000e+00 : f32
    %43 = vector.broadcast %cst_9 : f32 to vector<5x128xf32>
    %44 = arith.addf %43, %42 : vector<5x128xf32>
    %45 = math.log %44 : vector<5x128xf32>
    %46 = arith.addf %38, %45 : vector<5x128xf32>
    %47 = tpu.iota {dimensions = array<i32: 0>} : vector<5x128xi32>
    %c2_i32_10 = arith.constant 2 : i32
    %48 = vector.broadcast %c2_i32_10 : i32 to vector<5x128xi32>
    %49 = arith.cmpi sge, %47, %48 : vector<5x128xi32>
    %cst_11 = arith.constant 0.000000e+00 : f32
    %50 = vector.broadcast %cst_11 : f32 to vector<5x128xf32>
    %51 = arith.select %49, %46, %50 : vector<5x128xi1>, vector<5x128xf32>
    %cst_12 = arith.constant 0.000000e+00 : f32
    %52 = vector.broadcast %cst_12 : f32 to vector<1x128xf32>
    %53 = vector.extract_strided_slice %51 {offsets = [0, 0], sizes = [4, 128], strides = [1, 1]} : vector<5x128xf32> to vector<4x128xf32>
    %54 = tpu.concatenate %52, %53 in 0 : vector<1x128xf32>, vector<4x128xf32> -> vector<5x128xf32>
    %55 = arith.addf %51, %54 : vector<5x128xf32>
    %cst_13 = arith.constant 0.000000e+00 : f32
    %56 = vector.broadcast %cst_13 : f32 to vector<2x128xf32>
    %57 = vector.extract_strided_slice %55 {offsets = [0, 0], sizes = [3, 128], strides = [1, 1]} : vector<5x128xf32> to vector<3x128xf32>
    %58 = tpu.concatenate %56, %57 in 0 : vector<2x128xf32>, vector<3x128xf32> -> vector<5x128xf32>
    %59 = arith.addf %55, %58 : vector<5x128xf32>
    %cst_14 = arith.constant 0.000000e+00 : f32
    %60 = vector.broadcast %cst_14 : f32 to vector<4x128xf32>
    %61 = vector.extract_strided_slice %59 {offsets = [0, 0], sizes = [1, 128], strides = [1, 1]} : vector<5x128xf32> to vector<1x128xf32>
    %62 = tpu.concatenate %60, %61 in 0 : vector<4x128xf32>, vector<1x128xf32> -> vector<5x128xf32>
    %63 = arith.addf %59, %62 : vector<5x128xf32>
    %64 = arith.subf %17, %33 : vector<1x128xf32>
    %65 = vector.broadcast %4 : vector<1x128xi32> to vector<5x128xi32>
    %66 = arith.cmpi eq, %47, %65 : vector<5x128xi32>
    %67 = arith.extui %66 : vector<5x128xi1> to vector<5x128xi32>
    %68 = arith.sitofp %67 : vector<5x128xi32> to vector<5x128xf32>
    %69 = arith.mulf %63, %68 : vector<5x128xf32>
    %cst_15 = arith.constant dense<0.000000e+00> : vector<128xf32>
    %70 = vector.multi_reduction <add>, %69, %cst_15 [0] : vector<5x128xf32> to vector<128xf32>
    %71 = vector.shape_cast %70 : vector<128xf32> to vector<1x128xf32>
    %72 = arith.sitofp %4 : vector<1x128xi32> to vector<1x128xf32>
    %73 = arith.mulf %72, %64 : vector<1x128xf32>
    %74 = arith.subf %73, %71 : vector<1x128xf32>
    %75 = arith.sitofp %47 : vector<5x128xi32> to vector<5x128xf32>
    %76 = vector.broadcast %64 : vector<1x128xf32> to vector<5x128xf32>
    %77 = arith.mulf %75, %76 : vector<5x128xf32>
    %78 = arith.subf %77, %63 : vector<5x128xf32>
    %79 = vector.broadcast %5 : vector<1x128xi32> to vector<5x128xi32>
    %80 = arith.cmpi slt, %47, %79 : vector<5x128xi32>
    %cst_16 = arith.constant -1.000000e+30 : f32
    %81 = vector.broadcast %cst_16 : f32 to vector<5x128xf32>
    %82 = arith.select %80, %78, %81 : vector<5x128xi1>, vector<5x128xf32>
    %cst_17 = arith.constant dense<0xFF800000> : vector<128xf32>
    %83 = vector.multi_reduction <maximumf>, %82, %cst_17 [0] : vector<5x128xf32> to vector<128xf32>
    %84 = vector.shape_cast %83 : vector<128xf32> to vector<1x128xf32>
    %85 = vector.broadcast %84 : vector<1x128xf32> to vector<5x128xf32>
    %86 = arith.subf %82, %85 : vector<5x128xf32>
    %87 = math.exp %86 : vector<5x128xf32>
    %cst_18 = arith.constant dense<0.000000e+00> : vector<128xf32>
    %88 = vector.multi_reduction <add>, %87, %cst_18 [0] : vector<5x128xf32> to vector<128xf32>
    %89 = vector.shape_cast %88 : vector<128xf32> to vector<1x128xf32>
    %90 = math.log %89 : vector<1x128xf32>
    %91 = arith.addf %84, %90 : vector<1x128xf32>
    %92 = arith.subf %91, %74 : vector<1x128xf32>
    %93 = tpu.iota {dimensions = array<i32: 1>} : vector<1x128xi32>
    %c128_i32 = arith.constant 128 : i32
    %94 = arith.muli %arg0, %c128_i32 : i32
    %95 = vector.broadcast %94 : i32 to vector<1x128xi32>
    %96 = arith.addi %95, %93 : vector<1x128xi32>
    %c8_i32_19 = arith.constant 8 : i32
    %97 = vector.broadcast %c8_i32_19 : i32 to vector<1x128xi32>
    %98 = arith.cmpi slt, %96, %97 : vector<1x128xi32>
    %cst_20 = arith.constant 0.000000e+00 : f32
    %99 = vector.broadcast %cst_20 : f32 to vector<1x128xf32>
    %100 = arith.select %98, %92, %99 : vector<1x128xi1>, vector<1x128xf32>
    %c0_21 = arith.constant 0 : index
    %c0_22 = arith.constant 0 : index
    %101 = vector.load %arg4[%c0_21, %c0_22] : memref<1x128xf32, #tpu.memory_space<vmem>>, vector<1x128xf32>
    tpu.vector_store %arg4[%c0_21, %c0_22], %100 {strides = array<i32>} : memref<1x128xf32, #tpu.memory_space<vmem>>, vector<1x128xf32>,
    return
  }
  func.func @transform_0(%arg0: i32) -> (i32, i32) {
    %c0_i32 = arith.constant 0 : i32
    %c0_i32_0 = arith.constant 0 : i32
    %c0_i32_1 = arith.constant 0 : i32
    return %c0_i32, %c0_i32_0 : i32, i32
  }
  func.func @transform_1(%arg0: i32) -> (i32, i32) {
    %c0_i32 = arith.constant 0 : i32
    %c0_i32_0 = arith.constant 0 : i32
    %c0_i32_1 = arith.constant 0 : i32
    return %c0_i32, %c0_i32_0 : i32, i32
  }
  func.func @transform_2(%arg0: i32) -> (i32, i32) {
    %c0_i32 = arith.constant 0 : i32
    %c0_i32_0 = arith.constant 0 : i32
    return %c0_i32, %arg0 : i32, i32
  }
  func.func @transform_3(%arg0: i32) -> (i32, i32) {
    %c0_i32 = arith.constant 0 : i32
    %c0_i32_0 = arith.constant 0 : i32
    return %c0_i32, %arg0 : i32, i32
  }
}

</mosaic_0001>

<bundles_post_ra>
// kernel: tpu_custom_call.1
= control target key start
LH: loop header
LB: loop body
LE: loop exit
PB: predicated region body
PF: predicated region fallthrough
CT: control target
= control target key end

     0   :  { %8 = vsyncpa [#allocation3], 0  ;;  %s1011_s0 = inlined_call_operand.hbm [shape: f32[8,128], index: 0, kind: input, shape index: {}]   ;;  %s1012_s1 = inlined_call_operand.hbm [shape: f32[8,128], index: 1, kind: input, shape index: {}]   ;;  %s1013_s2 = inlined_call_operand.hbm [shape: s32[6,128], index: 2, kind: input, shape index: {}]   ;;  %s1014_s3 = inlined_call_operand.hbm [shape: f32[1,128], index: 3, kind: output, shape index: {}]  }
   0x1   :  { %9 = vsyncpa [#allocation6], 0 }
   0x2   :  { %10 = vsyncpa [#allocation4], 0  ;;  %s798_s12 = smov [#allocation5]   ;;  %s799_s14 = smov [#allocation2]  }
   0x3   :  { %s27_s13 = sshll.u32 %s798_s12, 4  ;;  %s17_s15 = sshll.u32 %s799_s14, 4  ;;  %s28_s13 = int_to_ptr.vmem [resolvable:$true] %s27_s13  ;;  %s18_s15 = int_to_ptr.vmem [resolvable:$true] %s17_s15 }
   0x4   :  { %s704_s18 = scalar_lea.hbm %s1012_s1, 128 }
   0x5   :  { %p705_p0 = scmp.ne.s32.totalorder %s1012_s1, %s704_s18  ;;  %p708_p1 = scmp.lt.u32.totalorder %s704_s18, %s1012_s1 }
   0x7   :  { %p710_p2 = pnand %p708_p1, %p705_p0 }
   0x9   :  { %713 = shalt.err (!%p710_p2)
}
   0xa   :  { %s714_s23 = scalar_lea.vmem %s28_s13, 128  ;;  %p719_p4 = scmp.lt.s32.totalorder %s28_s13, %s28_s13 }
   0xb   :  { %p715_p3 = scmp.ne.s32.totalorder %s28_s13, %s714_s23  ;;  %p720_p5 = scmp.lt.s32.totalorder %s714_s23, %s714_s23 }
   0xd   :  { %p721_p6 = por %p720_p5, %p719_p4 }
   0xf   :  { %p722_p7 = pnand %p721_p6, %p715_p3 }
  0x11   :  { %725 = shalt.err (!%p722_p7)
}
  0x12   :  { %30 = dma.hbm_to_vmem [thread:$0]  %s1012_s1, 128, %s28_s13, [#allocation6]  }
  0x13   :  { %s726_s28 = scalar_lea.hbm %s1011_s0, 128 }
  0x14   :  { %p727_p8 = scmp.ne.s32.totalorder %s1011_s0, %s726_s28  ;;  %p730_p9 = scmp.lt.u32.totalorder %s726_s28, %s1011_s0 }
  0x16   :  { %p732_p10 = pnand %p730_p9, %p727_p8 }
  0x18   :  { %735 = shalt.err (!%p732_p10)
}
  0x19   :  { %s736_s6 = scalar_lea.vmem %s18_s15, 128  ;;  %p741_p12 = scmp.lt.s32.totalorder %s18_s15, %s18_s15 }
  0x1a   :  { %p737_p11 = scmp.ne.s32.totalorder %s18_s15, %s736_s6  ;;  %p742_p13 = scmp.lt.s32.totalorder %s736_s6, %s736_s6 }
  0x1c   :  { %p743_p0 = por %p742_p13, %p741_p12 }
  0x1e   :  { %p744_p1 = pnand %p743_p0, %p737_p11 }
  0x20   :  { %747 = shalt.err (!%p744_p1)
}
  0x21   :  { %20 = dma.hbm_to_vmem [thread:$0]  %s1011_s0, 128, %s18_s15, [#allocation3]  }
  0x22   :  { %s800_s8 = smov [#allocation7]   ;;  %s748_s12 = scalar_lea.hbm %s1013_s2, 128 }
  0x23   :  { %s37_s9 = sshll.u32 %s800_s8, 4  ;;  %p749_p2 = scmp.ne.s32.totalorder %s1013_s2, %s748_s12  ;;  %s38_s9 = int_to_ptr.vmem [resolvable:$true] %s37_s9 }
  0x24   :  { %p752_p3 = scmp.lt.u32.totalorder %s748_s12, %s1013_s2 }
  0x26   :  { %p754_p4 = pnand %p752_p3, %p749_p2 }
  0x28   :  { %757 = shalt.err (!%p754_p4)
}
  0x29   :  { %s758_s18 = scalar_lea.vmem %s38_s9, 128  ;;  %p763_p6 = scmp.lt.s32.totalorder %s38_s9, %s38_s9 }
  0x2a   :  { %p759_p5 = scmp.ne.s32.totalorder %s38_s9, %s758_s18  ;;  %p764_p7 = scmp.lt.s32.totalorder %s758_s18, %s758_s18 }
  0x2c   :  { %p765_p8 = por %p764_p7, %p763_p6 }
  0x2e   :  { %p766_p9 = pnand %p765_p8, %p759_p5 }
  0x30   :  { %769 = shalt.err (!%p766_p9)
}
  0x31   :  { %40 = dma.hbm_to_vmem [thread:$0]  %s1013_s2, 128, %s38_s9, [#allocation6]  }
  0x32   :  { %792 = dma.done.wait [#allocation3], 128  }
  0x33   :  { %793 = vsyncadd [#allocation3], 4294967168 }
  0x34   :  { %794 = dma.done.wait [#allocation6], 256  }
  0x35   :  { %795 = vsyncadd [#allocation6], 4294967040  ;;  %v54_v0 = vlaneseq  ;;  %v801_v1 = vmov 0.0|0.0   ;;  %vm802_vm0 = vmmov 0   ;;  %v803_v2 = vmov 0.0   ;;  %v123_v34 = vld [vmem:[#allocation2] sm:$0xff] }
  0x36   :  { %640 = vmatprep.subr.bf16.mxu0 %v801_v1  ;;  %664 = vmatprep.subr.bf16.mxu1 %v801_v1  ;;  %v869_v4 = vld [vmem:[#allocation7] sm:$0x3f]  ;;  %v804_v21 = vmov 1.0|1.0   ;;  %v286_v35 = vld [vmem:[#allocation5] sm:$0xff]  ;;  %s805_s2 = smov [#allocation8]  }
  0x37   :  { %602 = vmatprep.mubr.msk.f32.mxu0 %vm802_vm0, %v803_v2  ;;  %637 = vmatprep.mubr.msk.f32.mxu1 %vm802_vm0, %v803_v2  ;;  %v867_v3 = vshrl.u32 %v54_v0, 7  ;;  %v51_v8 = vmul.u32 3, %v869_v4  ;;  %v52_v9 = vrot.slane %v869_v4, 5  ;;  %v194_v10 = vmul.u32 2, %v869_v4  ;;  %s461_s19 = sshll.u32 %s805_s2, 4  ;;  %s462_s19 = int_to_ptr.vmem [resolvable:$true] %s461_s19 }
  0x38   :  { %v195_v11 = vrot.slane %v869_v4, 1  ;;  %v197_v12 = vadd.s32 8, %v869_v4  ;;  %s770_s20 = scalar_lea.vmem %s462_s19, 16  ;;  %s774_s21 = scalar_lea.vmem %s462_s19, 32 }
  0x39   :  { %v73_v5 = vsub.s32 0, %v867_v3  ;;  %v200_v6 = vsub.s32 1, %v867_v3  ;;  %v220_v7 = vsub.s32 2, %v867_v3  ;;  %v56_v13 = vadd.s32 8, %v867_v3  ;;  %p771_p10 = scmp.ne.s32.totalorder %s462_s19, %s770_s20  ;;  %p775_p11 = scmp.lt.s32.totalorder %s462_s19, %s462_s19 }
  0x3a   :  { %v53_v14 = vadd.s32 %v52_v9, %v51_v8  ;;  %v196_v15 = vadd.s32 %v195_v11, %v194_v10  ;;  %v57_v19 = vadd.s32 16, %v867_v3  ;;  %v58_v20 = vadd.s32 24, %v867_v3  ;;  %p776_p12 = scmp.lt.s32.totalorder %s774_s21, %s770_s20 }
  0x3b   :  { %v880_v16 = vrot.slane %v197_v12, %v220_v7  ;;  %v59_v22 = vadd.s32 32, %v867_v3  ;;  %v60_v23 = vadd.s32 40, %v867_v3  ;;  %v61_v24 = vadd.s32 48, %v867_v3 }
  0x3c   :  { %v884_v17 = vrot.slane %v53_v14, %v73_v5  ;;  %v886_v18 = vrot.slane %v196_v15, %v200_v6  ;;  %v62_v25 = vadd.s32 56, %v867_v3  ;;  %v63_v26 = vadd.s32 64, %v867_v3  ;;  %p777_p13 = por %p776_p12, %p775_p11 }
  0x3d   :  { %vm222_vm1 = vcmp.eq.s32.totalorder %v867_v3, %v880_v16  ;;  %vm223_vm2 = vcmp.eq.s32.totalorder %v56_v13, %v880_v16  ;;  %vm224_vm13 = vcmp.eq.s32.totalorder %v57_v19, %v880_v16  ;;  %vm225_vm0 = vcmp.eq.s32.totalorder %v58_v20, %v880_v16 }
  0x3e   :  { %vm75_vm3 = vcmp.eq.s32.totalorder %v867_v3, %v884_v17  ;;  %vm76_vm4 = vcmp.eq.s32.totalorder %v56_v13, %v884_v17  ;;  %vm202_vm5 = vcmp.eq.s32.totalorder %v867_v3, %v886_v18  ;;  %vm203_vm6 = vcmp.eq.s32.totalorder %v56_v13, %v886_v18  ;;  %p778_p0 = pnand %p777_p13, %p771_p10 }
  0x3f   :  { %vm641_vm7 = vmpackc.low %vm76_vm4, %vm75_vm3  ;;  %vm77_vm9 = vcmp.eq.s32.totalorder %v57_v19, %v884_v17  ;;  %vm78_vm10 = vcmp.eq.s32.totalorder %v58_v20, %v884_v17  ;;  %vm204_vm12 = vcmp.eq.s32.totalorder %v57_v19, %v886_v18  ;;  %vm205_vm15 = vcmp.eq.s32.totalorder %v58_v20, %v886_v18 }
  0x40   :  { %642 = vmatpush3.bf16.msk.msra.mxu0 %vm641_vm7, %v804_v21  ;;  %vm238_vm8 = vmor %vm202_vm5, %vm222_vm1  ;;  %vm80_vm4 = vcmp.eq.s32.totalorder %v60_v23, %v884_v17  ;;  %vm226_vm7 = vcmp.eq.s32.totalorder %v59_v22, %v880_v16  ;;  %v64_v27 = vadd.s32 72, %v867_v3  ;;  %v65_v28 = vadd.s32 80, %v867_v3 }
  0x41   :  { %vm239_vm11 = vmor %vm203_vm6, %vm223_vm2  ;;  %643 = vmatprep.subr.bf16.mxu0 %v801_v1  ;;  %vm79_vm2 = vcmp.eq.s32.totalorder %v59_v22, %v884_v17  ;;  %vm206_vm6 = vcmp.eq.s32.totalorder %v59_v22, %v886_v18  ;;  %v66_v29 = vadd.s32 88, %v867_v3  ;;  %v67_v30 = vadd.s32 96, %v867_v3 }
  0x42   :  { %vm665_vm14 = vmpackc.low %vm239_vm11, %vm238_vm8  ;;  %v68_v31 = vadd.s32 104, %v867_v3  ;;  %v69_v32 = vadd.s32 112, %v867_v3  ;;  %v70_v33 = vadd.s32 120, %v867_v3  ;;  %v393_v54 = vsub.s32 3, %v867_v3 }
  0x43   :  { %666 = vmatpush3.bf16.msk.msra.mxu1 %vm665_vm14, %v804_v21  ;;  %vm644_vm1 = vmpackc.low %vm78_vm10, %vm77_vm9  ;;  %vm207_vm9 = vcmp.eq.s32.totalorder %v60_v23, %v886_v18  ;;  %vm227_vm10 = vcmp.eq.s32.totalorder %v60_v23, %v880_v16  ;;  %vm82_vm14 = vcmp.eq.s32.totalorder %v62_v25, %v884_v17  ;;  %v422_v59 = vsub.s32 4, %v867_v3 }
  0x44   :  { %667 = vmatprep.subr.bf16.mxu1 %v801_v1  ;;  %645 = vmatpush3.bf16.msk.msra.mxu0 %vm644_vm1, %v804_v21  ;;  %vm240_vm3 = vmor %vm204_vm12, %vm224_vm13  ;;  %vm81_vm13 = vcmp.eq.s32.totalorder %v61_v24, %v884_v17  ;;  %vm228_vm1 = vcmp.eq.s32.totalorder %v61_v24, %v880_v16  ;;  %v394_v57 = vrot.slane %v869_v4, %v393_v54  ;;  %v413_v62 = vcvt.s32.f32 %v867_v3 }
  0x45   :  { %vm241_vm5 = vmor %vm205_vm15, %vm225_vm0  ;;  %646 = vmatprep.subr.bf16.mxu0 %v801_v1  ;;  %vm208_vm0 = vcmp.eq.s32.totalorder %v61_v24, %v886_v18  ;;  %v423_v6 = vrot.slane %v869_v4, %v422_v59 }
  0x46   :  { %vm668_vm8 = vmpackc.low %vm241_vm5, %vm240_vm3 }
  0x47   :  { %669 = vmatpush3.bf16.msk.msra.mxu1 %vm668_vm8, %v804_v21  ;;  %vm647_vm11 = vmpackc.low %vm80_vm4, %vm79_vm2  ;;  %vm209_vm2 = vcmp.eq.s32.totalorder %v62_v25, %v886_v18  ;;  %vm229_vm4 = vcmp.eq.s32.totalorder %v62_v25, %v880_v16  ;;  %vm84_vm8 = vcmp.eq.s32.totalorder %v64_v27, %v884_v17 }
  0x48   :  { %670 = vmatprep.subr.bf16.mxu1 %v801_v1  ;;  %648 = vmatpush3.bf16.msk.msra.mxu0 %vm647_vm11, %v804_v21  ;;  %vm242_vm12 = vmor %vm206_vm6, %vm226_vm7  ;;  %vm83_vm7 = vcmp.eq.s32.totalorder %v63_v26, %v884_v17  ;;  %vm230_vm11 = vcmp.eq.s32.totalorder %v63_v26, %v880_v16 }
  0x49   :  { %vm243_vm15 = vmor %vm207_vm9, %vm227_vm10  ;;  %649 = vmatprep.subr.bf16.mxu0 %v801_v1  ;;  %vm210_vm10 = vcmp.eq.s32.totalorder %v63_v26, %v886_v18 }
  0x4a   :  { %vm671_vm3 = vmpackc.low %vm243_vm15, %vm242_vm12 }
  0x4b   :  { %672 = vmatpush3.bf16.msk.msra.mxu1 %vm671_vm3, %v804_v21  ;;  %vm650_vm5 = vmpackc.low %vm82_vm14, %vm81_vm13  ;;  %vm211_vm13 = vcmp.eq.s32.totalorder %v64_v27, %v886_v18  ;;  %vm231_vm14 = vcmp.eq.s32.totalorder %v64_v27, %v880_v16  ;;  %vm86_vm3 = vcmp.eq.s32.totalorder %v66_v29, %v884_v17 }
  0x4c   :  { %673 = vmatprep.subr.bf16.mxu1 %v801_v1  ;;  %651 = vmatpush3.bf16.msk.msra.mxu0 %vm650_vm5, %v804_v21  ;;  %vm244_vm6 = vmor %vm208_vm0, %vm228_vm1  ;;  %vm85_vm1 = vcmp.eq.s32.totalorder %v65_v28, %v884_v17  ;;  %vm232_vm5 = vcmp.eq.s32.totalorder %v65_v28, %v880_v16 }
  0x4d   :  { %vm245_vm9 = vmor %vm209_vm2, %vm229_vm4  ;;  %652 = vmatprep.subr.bf16.mxu0 %v801_v1  ;;  %vm212_vm4 = vcmp.eq.s32.totalorder %v65_v28, %v886_v18 }
  0x4e   :  { %vm674_vm12 = vmpackc.low %vm245_vm9, %vm244_vm6 }
  0x4f   :  { %675 = vmatpush3.bf16.msk.msra.mxu1 %vm674_vm12, %v804_v21  ;;  %vm653_vm15 = vmpackc.low %vm84_vm8, %vm83_vm7  ;;  %vm213_vm7 = vcmp.eq.s32.totalorder %v66_v29, %v886_v18  ;;  %vm233_vm8 = vcmp.eq.s32.totalorder %v66_v29, %v880_v16  ;;  %vm88_vm12 = vcmp.eq.s32.totalorder %v68_v31, %v884_v17 }
  0x50   :  { %676 = vmatprep.subr.bf16.mxu1 %v801_v1  ;;  %654 = vmatpush3.bf16.msk.msra.mxu0 %vm653_vm15, %v804_v21  ;;  %vm246_vm0 = vmor %vm210_vm10, %vm230_vm11  ;;  %vm87_vm11 = vcmp.eq.s32.totalorder %v67_v30, %v884_v17  ;;  %vm234_vm15 = vcmp.eq.s32.totalorder %v67_v30, %v880_v16 }
  0x51   :  { %vm247_vm2 = vmor %vm211_vm13, %vm231_vm14  ;;  %655 = vmatprep.subr.bf16.mxu0 %v801_v1  ;;  %vm214_vm14 = vcmp.eq.s32.totalorder %v67_v30, %v886_v18 }
  0x52   :  { %vm677_vm6 = vmpackc.low %vm247_vm2, %vm246_vm0 }
  0x53   :  { %678 = vmatpush3.bf16.msk.msra.mxu1 %vm677_vm6, %v804_v21  ;;  %vm656_vm9 = vmpackc.low %vm86_vm3, %vm85_vm1  ;;  %vm215_vm1 = vcmp.eq.s32.totalorder %v68_v31, %v886_v18  ;;  %vm235_vm3 = vcmp.eq.s32.totalorder %v68_v31, %v880_v16  ;;  %vm90_vm6 = vcmp.eq.s32.totalorder %v70_v33, %v884_v17 }
  0x54   :  { %679 = vmatprep.subr.bf16.mxu1 %v801_v1  ;;  %657 = vmatpush3.bf16.msk.msra.mxu0 %vm656_vm9, %v804_v21  ;;  %vm248_vm10 = vmor %vm212_vm4, %vm232_vm5  ;;  %vm89_vm5 = vcmp.eq.s32.totalorder %v69_v32, %v884_v17  ;;  %vm236_vm9 = vcmp.eq.s32.totalorder %v69_v32, %v880_v16 }
  0x55   :  { %vm249_vm13 = vmor %vm213_vm7, %vm233_vm8  ;;  %658 = vmatprep.subr.bf16.mxu0 %v801_v1  ;;  %vm216_vm8 = vcmp.eq.s32.totalorder %v69_v32, %v886_v18 }
  0x56   :  { %vm680_vm0 = vmpackc.low %vm249_vm13, %vm248_vm10  ;;  %vm217_vm13 = vcmp.eq.s32.totalorder %v70_v33, %v886_v18 }
  0x57   :  { %681 = vmatpush3.bf16.msk.msra.mxu1 %vm680_vm0, %v804_v21  ;;  %vm659_vm2 = vmpackc.low %vm88_vm12, %vm87_vm11  ;;  %vm237_vm11 = vcmp.eq.s32.totalorder %v70_v33, %v880_v16 }
  0x58   :  { %682 = vmatprep.subr.bf16.mxu1 %v801_v1  ;;  %660 = vmatpush3.bf16.msk.msra.mxu0 %vm659_vm2, %v804_v21  ;;  %vm250_vm4 = vmor %vm214_vm14, %vm234_vm15  ;;  %vm381_vm2 = vcmask 1041408  }
  0x59   :  { %vm251_vm7 = vmor %vm215_vm1, %vm235_vm3  ;;  %661 = vmatprep.subr.bf16.mxu0 %v801_v1  ;;  %vm367_vm1 = vcmp.ge.s32.totalorder %v867_v3, 2  ;;  %vm375_vm3 = vcmask 1040384  }
  0x5a   :  { %vm683_vm10 = vmpackc.low %vm251_vm7, %vm250_vm4  ;;  %vm395_vm4 = vcmp.eq.s32.totalorder %v867_v3, %v394_v57  ;;  %vm424_vm7 = vcmp.lt.s32.totalorder %v867_v3, %v423_v6 }
  0x5b   :  { %684 = vmatpush3.bf16.msk.msra.mxu1 %vm683_vm10, %v804_v21  ;;  %vm662_vm12 = vmpackc.low %vm90_vm6, %vm89_vm5  ;;  %vm387_vm5 = vcmask 1043456   ;;  %v535_v7 = vsel %vm395_vm4, 1.0, %v803_v2  ;;  %vm399_vm6 = vcmask 1044480   ;;  %v407_v2 = vcvt.s32.f32 %v869_v4 }
  0x5c   :  { %685 = vmatprep.subr.bf16.mxu1 %v801_v1  ;;  %663 = vmatpush3.bf16.msk.msra.mxu0 %vm662_vm12, %v804_v21  ;;  %vm252_vm14 = vmor %vm216_vm8, %vm236_vm9 }
  0x5d   :  { %vm253_vm15 = vmor %vm217_vm13, %vm237_vm11 }
  0x5e   :  { %vm686_vm0 = vmpackc.low %vm253_vm15, %vm252_vm14 }
  0x5f   :  { %687 = vmatpush3.bf16.msk.msra.mxu1 %vm686_vm0, %v804_v21  ;;  %603 = vmatmul.mubr.f32.vlgmr.msra.gmra.mrb[0].mxu0 %v123_v34 }
  0x62   :  { %638 = vmatmul.mubr.f32.vlgmr.msra.gmra.mrb[0].mxu1 %v286_v35 }
 0x132   :  { %v190_v36 = vpop.f32.mrb[0].mxu0 }
 0x133   :  { %v604_v37 = vpop.f32.mrb[1].mxu0 }
 0x135   :  { %v353_v38 = vpop.f32.mrb[0].mxu1 }
 0x136   :  { %v357_v39 = vmul.f32 0.2, %v353_v38  ;;  %v390_v40 = vsub.f32 %v190_v36, %v353_v38  ;;  %v639_v41 = vpop.f32.mrb[1].mxu1 }
 0x138   :  { %v359_v42 = vand.u32 2147483647, %v357_v39  ;;  %v358_v48 = vmax.f32 %v357_v39, 0.0  ;;  %v417_v63 = vrot.slane %v390_v40, %v73_v5  ;;  %v409_v21 = vrot.slane %v390_v40, 5 }
 0x139   :  { %v448_v39 = vand.u32 127, %v54_v0 }
 0x13a   :  { %v360_v43 = vsub.f32 0.0, %v359_v42  ;;  %v418_v10 = vmul.f32 %v417_v63, %v413_v62  ;;  %v411_v25 = vmul.f32 %v409_v21, %v407_v2 }
 0x13b   :  { %vm452_vm8 = vcmp.lt.s32.totalorder %v448_v39, 8 }
 0x13c   :  { %v361_v44 = vmul.f32 1.442695, %v360_v43 }
 0x13e   :  { %696 = vpow2.f32 %v361_v44 }
 0x148   :  { %v697_v45 = vpop.eup %696 }
 0x149   :  { %v363_v46 = vadd.f32 1.0, %v697_v45 }
 0x14b   :  { %698 = vlog2.f32 %v363_v46 }
 0x155   :  { %v699_v47 = vpop.eup %698 }
 0x156   :  { %v365_v49 = vmul.f32 0.6931472, %v699_v47 }
 0x158   :  { %v366_v50 = vadd.f32 %v365_v49, %v358_v48 }
 0x15a   :  { %v369_v51 = vrot.slane %v366_v50, 1 }
 0x15c   :  { %v371_v52 = vsel %vm367_vm1, %v369_v51, 0.0 }
 0x15d   :  { %v373_v53 = vrot.slane %v371_v52, 7 }
 0x15f   :  { %v376_v55 = vsel %vm375_vm3, 0.0, %v373_v53 }
 0x160   :  { %v377_v56 = vadd.f32 %v376_v55, %v371_v52 }
 0x162   :  { %v379_v58 = vrot.slane %v377_v56, 6 }
 0x164   :  { %v382_v60 = vsel %vm381_vm2, 0.0, %v379_v58 }
 0x165   :  { %v383_v61 = vadd.f32 %v382_v60, %v377_v56 }
 0x167   :  { %v385_v1 = vrot.slane %v383_v61, 4 }
 0x169   :  { %v388_v8 = vsel %vm387_vm5, 0.0, %v385_v1 }
 0x16a   :  { %v389_v9 = vadd.f32 %v388_v8, %v383_v61 }
 0x16c   :  { %v398_v11 = vmul.f32 %v535_v7, %v389_v9  ;;  %v419_v12 = vsub.f32 %v418_v10, %v389_v9 }
 0x16e   :  { %v425_v13 = vsel %vm424_vm7, %v419_v12, -1e+30  ;;  %v400_v14 = vsel %vm399_vm6, %v398_v11, 0.0 }
 0x16f   :  { %v426_v15 = vsel %vm399_vm6, %v425_v13, -inf  ;;  %v401_v16 = vrot.slane %v400_v14, 4 }
 0x170   :  { %v427_v5 = vrot.slane %v426_v15, 4 }
 0x171   :  { %v402_v17 = vadd.f32 %v401_v16, %v400_v14 }
 0x172   :  { %v428_v18 = vmax.f32 %v426_v15, %v427_v5 }
 0x173   :  { %v403_v19 = vrot.slane %v402_v17, 2 }
 0x174   :  { %v429_v20 = vrot.slane %v428_v18, 2 }
 0x175   :  { %v404_v22 = vadd.f32 %v403_v19, %v402_v17 }
 0x176   :  { %v430_v23 = vmax.f32 %v428_v18, %v429_v20 }
 0x177   :  { %v405_v24 = vrot.slane %v404_v22, 1 }
 0x178   :  { %v431_v3 = vrot.slane %v430_v23, 1 }
 0x179   :  { %v406_v26 = vadd.f32 %v405_v24, %v404_v22 }
 0x17a   :  { %v432_v27 = vmax.f32 %v430_v23, %v431_v3 }
 0x17b   :  { %v412_v28 = vsub.f32 %v411_v25, %v406_v26 }
 0x17c   :  { %v433_v29 = vsub.f32 %v425_v13, %v432_v27 }
 0x17e   :  { %v434_v30 = vmul.f32 1.442695, %v433_v29 }
 0x180   :  { %700 = vpow2.f32 %v434_v30 }
 0x18a   :  { %v701_v31 = vpop.eup %700 }
 0x18b   :  { %v436_v32 = vsel %vm399_vm6, %v701_v31, 0.0 }
 0x18c   :  { %v437_v33 = vrot.slane %v436_v32, 4 }
 0x18e   :  { %v438_v34 = vadd.f32 %v437_v33, %v436_v32 }
 0x190   :  { %v439_v35 = vrot.slane %v438_v34, 2 }
 0x192   :  { %v440_v36 = vadd.f32 %v439_v35, %v438_v34 }
 0x194   :  { %v441_v4 = vrot.slane %v440_v36, 1 }
 0x196   :  { %v442_v37 = vadd.f32 %v441_v4, %v440_v36 }
 0x198   :  { %702 = vlog2.f32 %v442_v37 }
 0x1a2   :  { %v703_v38 = vpop.eup %702 }
 0x1a3   :  { %v444_v40 = vmul.f32 0.6931472, %v703_v38 }
 0x1a5   :  { %v445_v41 = vadd.f32 %v444_v40, %v432_v27 }
 0x1a7   :  { %v446_v42 = vsub.f32 %v445_v41, %v412_v28 }
 0x1a9   :  { %v453_v43 = vsel %vm452_vm8, %v446_v42, 0.0 }
 0x1aa   :  { %454 = vst [vmem:[#allocation8 - $0x3] sm:$0x8] %v453_v43 }
 0x1ab   :  { %781 = shalt.err (!%p778_p0)
}
 0x1ac   :  { %s782_s24 = scalar_lea.hbm %s1014_s3, 16 }
 0x1ad   :  { %p783_p1 = scmp.ne.s32.totalorder %s1014_s3, %s782_s24  ;;  %p786_p2 = scmp.lt.u32.totalorder %s782_s24, %s1014_s3 }
 0x1af   :  { %p788_p3 = pnand %p786_p2, %p783_p1 }
 0x1b1   :  { %791 = shalt.err (!%p788_p3)
}
 0x1b2   :  { %464 = dma.vmem_to_hbm [thread:$0]  %s462_s19, 16, %s1014_s3, [#allocation4]  }
 0x1b3   :  { %796 = dma.done.wait [#allocation4], 16  }
 0x1b4   :  { %797 = vsyncadd [#allocation4], 4294967280 }
 0x1b5   :  { %468 = vsyncpa [#allocation3], 1 }
 0x1b6   :  { %469 = vsyncpa [#allocation6], 1 }
 0x1b7   :  { %470 = vsyncpa [#allocation4], 1 }

</bundles_post_ra>
